<compile_context>
chip_gen: v5e
topology: v5e:2x2
jax: 0.10.0
libtpu: 0.0.40
codegen_flags: <defaults>
</compile_context>

<pallas_src>
import math
import functools

import jax
import jax.numpy as jnp
from jax.experimental import pallas as pl
from jax.experimental.pallas import tpu as pltpu

LANE = 128


def _round_up(n, m):
    return ((n + m - 1) // m) * m


def ddpg_actor_kernel(x_ref, w1_ref, b1_ref, w2_ref, b2_ref, w3_ref, b3_ref,
                      o_ref):
    """Fused 3-layer MLP: relu, relu, tanh on one batch tile."""
    x = x_ref[...]
    # input layer + relu
    h = jnp.dot(x, w1_ref[...], preferred_element_type=jnp.float32) + b1_ref[...]
    h = jnp.maximum(h, 0.0)
    # hidden layer + relu
    h = jnp.dot(h, w2_ref[...], preferred_element_type=jnp.float32) + b2_ref[...]
    h = jnp.maximum(h, 0.0)
    # output layer + tanh
    y = jnp.dot(h, w3_ref[...], preferred_element_type=jnp.float32) + b3_ref[...]
    o_ref[...] = jnp.tanh(y)


def _pad2d(a, rows, cols):
    r, c = a.shape
    return jnp.pad(a, ((0, rows - r), (0, cols - c)))


def pad_params(params):
    """Zero-pad hidden / output widths to full 128-lane vregs.

    Zero columns in b1/b2/b3 and zero rows/cols in w2/w3 guarantee the padded
    activations are exactly 0 through relu and tanh, so they never affect the
    real outputs.
    """
    w1, b1 = params["w1"], params["b1"]
    w2, b2 = params["w2"], params["b2"]
    w3, b3 = params["w3"], params["b3"]
    S, H1 = w1.shape
    _, H2 = w2.shape
    _, A = w3.shape
    H1p = _round_up(H1, LANE)
    H2p = _round_up(H2, LANE)
    Ap = _round_up(A, LANE)
    return (
        _pad2d(w1, S, H1p), _pad2d(b1, 1, H1p),
        _pad2d(w2, H1p, H2p), _pad2d(b2, 1, H2p),
        _pad2d(w3, H2p, Ap), _pad2d(b3, 1, Ap),
    )


@functools.partial(jax.jit, static_argnames=("tb",))
def ddpg_actor_forward(x, params, *, tb=256):
    """x: [B, state_size] float32.  params: dict of (w1,b1,w2,b2,w3,b3)."""
    w1p, b1p, w2p, b2p, w3p, b3p = pad_params(params)

    B, S = x.shape
    A = params["w3"].shape[1]          # true action size (unpadded)
    H1p = w1p.shape[1]
    H2p = w2p.shape[1]
    Ap = w3p.shape[1]

    # Batch tile: at most `tb`, but never larger than needed; multiple of 8
    # (sublane granularity).  VMEM footprint per step is tiny (<1 MiB at
    # tb=256), safely inside v7x's 64 MiB / 32 MiB-scoped budget.
    tb_eff = min(tb, _round_up(B, 8))
    padded_B = _round_up(B, tb_eff)
    if padded_B != B:
        x = jnp.pad(x, ((0, padded_B - B), (0, 0)))
    grid = (padded_B // tb_eff,)

    out = pl.pallas_call(
        ddpg_actor_kernel,
        out_shape=jax.ShapeDtypeStruct((padded_B, Ap), jnp.float32),
        grid=grid,
        in_specs=[
            # x: batch-tiled, double-buffered by the pipeline.
            pl.BlockSpec((tb_eff, S), lambda i: (i, 0)),
            # Weights / biases: constant block index -> stay resident in VMEM,
            # no re-DMA across grid steps.
            pl.BlockSpec((S, H1p), lambda i: (0, 0)),
            pl.BlockSpec((1, H1p), lambda i: (0, 0)),
            pl.BlockSpec((H1p, H2p), lambda i: (0, 0)),
            pl.BlockSpec((1, H2p), lambda i: (0, 0)),
            pl.BlockSpec((H2p, Ap), lambda i: (0, 0)),
            pl.BlockSpec((1, Ap), lambda i: (0, 0)),
        ],
        out_specs=pl.BlockSpec((tb_eff, Ap), lambda i: (i, 0)),
        compiler_params=pltpu.CompilerParams(
            dimension_semantics=("parallel",)),
    )(x, w1p, b1p, w2p, b2p, w3p, b3p)

    # Strip batch padding and the lane-padded output columns.
    return out[:B, :A]


def init_params(key, state_size, action_size=4, hidden_dims=(64, 64)):
    """Deterministic init mirroring DDPG_Actor.weigths_bias_initialization."""
    k = jax.random.split(key, 6)
    std_in = 1.0 / math.sqrt(state_size)
    std_h = 1.0 / math.sqrt(hidden_dims[0])
    std_out = 0.003
    params = {
        # input layer: U(-std_in, std_in) weights; bias set to +std_in
        # (PyTorch code uses .uniform_(std, std) -> constant std for the bias)
        "w1": jax.random.uniform(k[0], (state_size, hidden_dims[0]),
                                 jnp.float32, -std_in, std_in),
        "b1": jnp.full((1, hidden_dims[0]), std_in, jnp.float32),
        # hidden layer: U(-std_h, std_h)
        "w2": jax.random.uniform(k[1], (hidden_dims[0], hidden_dims[1]),
                                 jnp.float32, -std_h, std_h),
        "b2": jax.random.uniform(k[2], (1, hidden_dims[1]),
                                 jnp.float32, -std_h, std_h),
        # output layer: U(-0.003, 0.003)
        "w3": jax.random.uniform(k[3], (hidden_dims[1], action_size),
                                 jnp.float32, -std_out, std_out),
        "b3": jax.random.uniform(k[4], (1, action_size),
                                 jnp.float32, -std_out, std_out),
    }
    return params


def reference_forward(x, p):
    h = jnp.maximum(x @ p["w1"] + p["b1"], 0.0)
    h = jnp.maximum(h @ p["w2"] + p["b2"], 0.0)
    return jnp.tanh(h @ p["w3"] + p["b3"])


if __name__ == "__main__":
    key = jax.random.PRNGKey(0)
    k_param, k_x1, k_x2 = jax.random.split(key, 3)

    state_size = 16
    action_size = 4
    batch = 2

    params = init_params(k_param, state_size, action_size, hidden_dims=(64, 64))

    # Small batch (module-sized): single grid step.
    x = jax.random.normal(k_x1, (batch, state_size), jnp.float32)
    out = jax.block_until_ready(ddpg_actor_forward(x, params))
    ref = reference_forward(x, params)
    assert out.shape == (batch, action_size)
    assert jnp.allclose(out, ref, atol=1e-5, rtol=1e-5), "mismatch (small batch)"

    # Slightly larger batch with a tiny tile to exercise the batch grid,
    # pipelining, and the padding/slicing path (20 rows, TB=8 -> 3 grid steps).
    x2 = jax.random.normal(k_x2, (20, state_size), jnp.float32)
    out2 = jax.block_until_ready(ddpg_actor_forward(x2, params, tb=8))
    ref2 = reference_forward(x2, params)
    assert out2.shape == (20, action_size)
    assert jnp.allclose(out2, ref2, atol=1e-5, rtol=1e-5), "mismatch (gridded)"

    print("KERNEL_OK")
</pallas_src>

<mosaic_0001>
module attributes {stable_mosaic.version = 11 : i64} {
  func.func @ddpg_actor_kernel(%arg0: i32, %arg1: memref<8x16xf32, #tpu.memory_space<vmem>>, %arg2: memref<16x128xf32, #tpu.memory_space<vmem>>, %arg3: memref<1x128xf32, #tpu.memory_space<vmem>>, %arg4: memref<128x128xf32, #tpu.memory_space<vmem>>, %arg5: memref<1x128xf32, #tpu.memory_space<vmem>>, %arg6: memref<128x128xf32, #tpu.memory_space<vmem>>, %arg7: memref<1x128xf32, #tpu.memory_space<vmem>>, %arg8: memref<8x128xf32, #tpu.memory_space<vmem>>) attributes {dimension_semantics = [#tpu.dimension_semantics<parallel>], iteration_bounds = array<i64: 1>, scalar_prefetch = 0 : i64, scratch_operands = 0 : i64, tpu.core_type = #tpu.core_type<tc>, window_params = [{transform_indices = @transform_0, window_bounds = array<i64: 8, 16>}, {pipeline_mode = #tpu.pipeline_mode<synchronous>, transform_indices = @transform_1, window_bounds = array<i64: 16, 128>}, {pipeline_mode = #tpu.pipeline_mode<synchronous>, transform_indices = @transform_2, window_bounds = array<i64: 1, 128>}, {pipeline_mode = #tpu.pipeline_mode<synchronous>, transform_indices = @transform_3, window_bounds = array<i64: 128, 128>}, {pipeline_mode = #tpu.pipeline_mode<synchronous>, transform_indices = @transform_4, window_bounds = array<i64: 1, 128>}, {pipeline_mode = #tpu.pipeline_mode<synchronous>, transform_indices = @transform_5, window_bounds = array<i64: 128, 128>}, {pipeline_mode = #tpu.pipeline_mode<synchronous>, transform_indices = @transform_6, window_bounds = array<i64: 1, 128>}, {transform_indices = @transform_7, window_bounds = array<i64: 8, 128>}]} {
    %c0 = arith.constant 0 : index
    %c0_0 = arith.constant 0 : index
    %0 = vector.load %arg1[%c0, %c0_0] : memref<8x16xf32, #tpu.memory_space<vmem>>, vector<8x16xf32>
    %c0_1 = arith.constant 0 : index
    %c0_2 = arith.constant 0 : index
    %1 = vector.load %arg2[%c0_1, %c0_2] : memref<16x128xf32, #tpu.memory_space<vmem>>, vector<16x128xf32>
    %cst = arith.constant dense<0.000000e+00> : vector<8x128xf32>
    %2 = tpu.matmul %0, %1, %cst {dimension_numbers = #tpu.dot_dimension_numbers<[1], [0], [0], [1], [0, 0, 1, 1], [], []>} : vector<8x16xf32>, vector<16x128xf32>, vector<8x128xf32> -> vector<8x128xf32>
    %c0_3 = arith.constant 0 : index
    %c0_4 = arith.constant 0 : index
    %3 = vector.load %arg3[%c0_3, %c0_4] : memref<1x128xf32, #tpu.memory_space<vmem>>, vector<1x128xf32>
    %4 = vector.broadcast %3 : vector<1x128xf32> to vector<8x128xf32>
    %5 = arith.addf %2, %4 : vector<8x128xf32>
    %cst_5 = arith.constant 0.000000e+00 : f32
    %6 = vector.broadcast %cst_5 : f32 to vector<8x128xf32>
    %7 = arith.maximumf %5, %6 : vector<8x128xf32>
    %c0_6 = arith.constant 0 : index
    %c0_7 = arith.constant 0 : index
    %8 = vector.load %arg4[%c0_6, %c0_7] : memref<128x128xf32, #tpu.memory_space<vmem>>, vector<128x128xf32>
    %cst_8 = arith.constant dense<0.000000e+00> : vector<8x128xf32>
    %9 = tpu.matmul %7, %8, %cst_8 {dimension_numbers = #tpu.dot_dimension_numbers<[1], [0], [0], [1], [0, 0, 1, 1], [], []>} : vector<8x128xf32>, vector<128x128xf32>, vector<8x128xf32> -> vector<8x128xf32>
    %c0_9 = arith.constant 0 : index
    %c0_10 = arith.constant 0 : index
    %10 = vector.load %arg5[%c0_9, %c0_10] : memref<1x128xf32, #tpu.memory_space<vmem>>, vector<1x128xf32>
    %11 = vector.broadcast %10 : vector<1x128xf32> to vector<8x128xf32>
    %12 = arith.addf %9, %11 : vector<8x128xf32>
    %cst_11 = arith.constant 0.000000e+00 : f32
    %13 = vector.broadcast %cst_11 : f32 to vector<8x128xf32>
    %14 = arith.maximumf %12, %13 : vector<8x128xf32>
    %c0_12 = arith.constant 0 : index
    %c0_13 = arith.constant 0 : index
    %15 = vector.load %arg6[%c0_12, %c0_13] : memref<128x128xf32, #tpu.memory_space<vmem>>, vector<128x128xf32>
    %cst_14 = arith.constant dense<0.000000e+00> : vector<8x128xf32>
    %16 = tpu.matmul %14, %15, %cst_14 {dimension_numbers = #tpu.dot_dimension_numbers<[1], [0], [0], [1], [0, 0, 1, 1], [], []>} : vector<8x128xf32>, vector<128x128xf32>, vector<8x128xf32> -> vector<8x128xf32>
    %c0_15 = arith.constant 0 : index
    %c0_16 = arith.constant 0 : index
    %17 = vector.load %arg7[%c0_15, %c0_16] : memref<1x128xf32, #tpu.memory_space<vmem>>, vector<1x128xf32>
    %18 = vector.broadcast %17 : vector<1x128xf32> to vector<8x128xf32>
    %19 = arith.addf %16, %18 : vector<8x128xf32>
    %20 = math.tanh %19 : vector<8x128xf32>
    %c0_17 = arith.constant 0 : index
    %c0_18 = arith.constant 0 : index
    %21 = vector.load %arg8[%c0_17, %c0_18] : memref<8x128xf32, #tpu.memory_space<vmem>>, vector<8x128xf32>
    tpu.vector_store %arg8[%c0_17, %c0_18], %20 {strides = array<i32>} : memref<8x128xf32, #tpu.memory_space<vmem>>, vector<8x128xf32>,
    return
  }
  func.func @transform_0(%arg0: i32) -> (i32, i32) {
    %c0_i32 = arith.constant 0 : i32
    %c0_i32_0 = arith.constant 0 : i32
    return %arg0, %c0_i32 : i32, i32
  }
  func.func @transform_1(%arg0: i32) -> (i32, i32) {
    %c0_i32 = arith.constant 0 : i32
    %c0_i32_0 = arith.constant 0 : i32
    %c0_i32_1 = arith.constant 0 : i32
    return %c0_i32, %c0_i32_0 : i32, i32
  }
  func.func @transform_2(%arg0: i32) -> (i32, i32) {
    %c0_i32 = arith.constant 0 : i32
    %c0_i32_0 = arith.constant 0 : i32
    %c0_i32_1 = arith.constant 0 : i32
    return %c0_i32, %c0_i32_0 : i32, i32
  }
  func.func @transform_3(%arg0: i32) -> (i32, i32) {
    %c0_i32 = arith.constant 0 : i32
    %c0_i32_0 = arith.constant 0 : i32
    %c0_i32_1 = arith.constant 0 : i32
    return %c0_i32, %c0_i32_0 : i32, i32
  }
  func.func @transform_4(%arg0: i32) -> (i32, i32) {
    %c0_i32 = arith.constant 0 : i32
    %c0_i32_0 = arith.constant 0 : i32
    %c0_i32_1 = arith.constant 0 : i32
    return %c0_i32, %c0_i32_0 : i32, i32
  }
  func.func @transform_5(%arg0: i32) -> (i32, i32) {
    %c0_i32 = arith.constant 0 : i32
    %c0_i32_0 = arith.constant 0 : i32
    %c0_i32_1 = arith.constant 0 : i32
    return %c0_i32, %c0_i32_0 : i32, i32
  }
  func.func @transform_6(%arg0: i32) -> (i32, i32) {
    %c0_i32 = arith.constant 0 : i32
    %c0_i32_0 = arith.constant 0 : i32
    %c0_i32_1 = arith.constant 0 : i32
    return %c0_i32, %c0_i32_0 : i32, i32
  }
  func.func @transform_7(%arg0: i32) -> (i32, i32) {
    %c0_i32 = arith.constant 0 : i32
    %c0_i32_0 = arith.constant 0 : i32
    return %arg0, %c0_i32 : i32, i32
  }
}

</mosaic_0001>

<bundles_post_ra>
// kernel: ddpg_actor_forward.1
= control target key start
LH: loop header
LB: loop body
LE: loop exit
PB: predicated region body
PF: predicated region fallthrough
CT: control target
= control target key end

     0   :  { %vm33_vm0 = vcmask 130048   ;;  %s308_s1 = inlined_call_operand.vmem [shape: f32[16,128], index: 1, kind: input, shape index: {}]   ;;  %s309_s0 = inlined_call_operand.vmem [shape: f32[8,16], index: 0, kind: input, shape index: {}]   ;;  %s310_s3 = inlined_call_operand.vmem [shape: f32[128,128], index: 3, kind: input, shape index: {}]   ;;  %s311_s2 = inlined_call_operand.vmem [shape: f32[1,128], index: 2, kind: input, shape index: {}]   ;;  %s312_s4 = inlined_call_operand.vmem [shape: f32[1,128], index: 4, kind: input, shape index: {}]   ;;  %s313_s5 = inlined_call_operand.vmem [shape: f32[128,128], index: 5, kind: input, shape index: {}]   ;;  %s314_s6 = inlined_call_operand.vmem [shape: f32[1,128], index: 6, kind: input, shape index: {}]   ;;  %s315_s7 = inlined_call_operand.vmem [shape: f32[8,128], index: 7, kind: output, shape index: {}]  }
   0x1   :  { %v28_v0 = vld [vmem:[%s308_s1 + $0x8] sm:$0xff]  ;;  %v27_v1 = vld [vmem:[%s308_s1] sm:$0xff]  ;;  %v73_v3 = vld [vmem:[%s310_s3 + $0x78] sm:$0xff] }
   0x2   :  { %51 = vmatpush.msra.mxu0 %v28_v0  ;;  %v26_v2 = vld [vmem:[%s309_s0] sm:$0xff]  ;;  %v72_v4 = vld [vmem:[%s310_s3 + $0x70] sm:$0xff]  ;;  %78 = vmatpush.msra.mxu1 %v73_v3  ;;  %v71_v5 = vld [vmem:[%s310_s3 + $0x68] sm:$0xff] }
   0x3   :  { %v70_v6 = vld [vmem:[%s310_s3 + $0x60] sm:$0xff]  ;;  %v69_v7 = vld [vmem:[%s310_s3 + $0x58] sm:$0xff]  ;;  %v68_v8 = vld [vmem:[%s310_s3 + $0x50] sm:$0xff] }
   0x4   :  { %52 = vmatpush.msra.mxu0 %v27_v1  ;;  %79 = vmatpush.msra.mxu1 %v72_v4  ;;  %v67_v9 = vld [vmem:[%s310_s3 + $0x48] sm:$0xff]  ;;  %v66_v10 = vld [vmem:[%s310_s3 + $0x40] sm:$0xff]  ;;  %v65_v11 = vld [vmem:[%s310_s3 + $0x38] sm:$0xff] }
   0x5   :  { %145 = vmatmul.msk.f32.vlgmr.msra.gmra.mxu0 %vm33_vm0, %v26_v2  ;;  %v64_v12 = vld [vmem:[%s310_s3 + $0x30] sm:$0xff]  ;;  %v63_v13 = vld [vmem:[%s310_s3 + $0x28] sm:$0xff]  ;;  %v62_v14 = vld [vmem:[%s310_s3 + $0x20] sm:$0xff] }
   0x6   :  { %80 = vmatpush.msra.mxu1 %v71_v5  ;;  %v61_v15 = vld [vmem:[%s310_s3 + $0x18] sm:$0xff]  ;;  %v60_v16 = vld [vmem:[%s310_s3 + $0x10] sm:$0xff]  ;;  %v59_v17 = vld [vmem:[%s310_s3 + $0x8] sm:$0xff] }
   0x7   :  { %v58_v18 = vld [vmem:[%s310_s3] sm:$0xff]  ;;  %v114_v19 = vld [vmem:[%s313_s5 + $0x78] sm:$0xff]  ;;  %v113_v20 = vld [vmem:[%s313_s5 + $0x70] sm:$0xff] }
   0x8   :  { %81 = vmatpush.msra.mxu1 %v70_v6  ;;  %119 = vmatpush.msra.mxu2 %v114_v19  ;;  %v112_v21 = vld [vmem:[%s313_s5 + $0x68] sm:$0xff]  ;;  %v111_v22 = vld [vmem:[%s313_s5 + $0x60] sm:$0xff]  ;;  %v110_v23 = vld [vmem:[%s313_s5 + $0x58] sm:$0xff] }
   0x9   :  { %v109_v24 = vld [vmem:[%s313_s5 + $0x50] sm:$0xff]  ;;  %v108_v25 = vld [vmem:[%s313_s5 + $0x48] sm:$0xff]  ;;  %v107_v26 = vld [vmem:[%s313_s5 + $0x40] sm:$0xff] }
   0xa   :  { %82 = vmatpush.msra.mxu1 %v69_v7  ;;  %120 = vmatpush.msra.mxu2 %v113_v20  ;;  %v106_v27 = vld [vmem:[%s313_s5 + $0x38] sm:$0xff]  ;;  %v105_v28 = vld [vmem:[%s313_s5 + $0x30] sm:$0xff]  ;;  %v104_v29 = vld [vmem:[%s313_s5 + $0x28] sm:$0xff] }
   0xb   :  { %v103_v30 = vld [vmem:[%s313_s5 + $0x20] sm:$0xff]  ;;  %v102_v31 = vld [vmem:[%s313_s5 + $0x18] sm:$0xff]  ;;  %v101_v36 = vld [vmem:[%s313_s5 + $0x10] sm:$0xff] }
   0xc   :  { %83 = vmatpush.msra.mxu1 %v68_v8  ;;  %121 = vmatpush.msra.mxu2 %v112_v21  ;;  %v146_v32 = vld [vmem:[%s311_s2] ss:$0 sm:$0xff]  ;;  %v100_v37 = vld [vmem:[%s313_s5 + $0x8] sm:$0xff] }
   0xd   :  { %v99_v38 = vld [vmem:[%s313_s5] sm:$0xff] }
   0xe   :  { %84 = vmatpush.msra.mxu1 %v67_v9  ;;  %122 = vmatpush.msra.mxu2 %v111_v22  ;;  %v147_v39 = vld [vmem:[%s312_s4] ss:$0 sm:$0xff] }
   0xf   :  { %v148_v43 = vld [vmem:[%s314_s6] ss:$0 sm:$0xff] }
  0x10   :  { %85 = vmatpush.msra.mxu1 %v66_v10  ;;  %123 = vmatpush.msra.mxu2 %v110_v23 }
  0x12   :  { %86 = vmatpush.msra.mxu1 %v65_v11  ;;  %124 = vmatpush.msra.mxu2 %v109_v24 }
  0x14   :  { %87 = vmatpush.msra.mxu1 %v64_v12  ;;  %125 = vmatpush.msra.mxu2 %v108_v25 }
  0x16   :  { %88 = vmatpush.msra.mxu1 %v63_v13  ;;  %126 = vmatpush.msra.mxu2 %v107_v26 }
  0x18   :  { %89 = vmatpush.msra.mxu1 %v62_v14  ;;  %127 = vmatpush.msra.mxu2 %v106_v27 }
  0x1a   :  { %90 = vmatpush.msra.mxu1 %v61_v15  ;;  %128 = vmatpush.msra.mxu2 %v105_v28 }
  0x1c   :  { %91 = vmatpush.msra.mxu1 %v60_v16  ;;  %129 = vmatpush.msra.mxu2 %v104_v29 }
  0x1e   :  { %92 = vmatpush.msra.mxu1 %v59_v17  ;;  %130 = vmatpush.msra.mxu2 %v103_v30 }
  0x20   :  { %93 = vmatpush.msra.mxu1 %v58_v18  ;;  %131 = vmatpush.msra.mxu2 %v102_v31 }
  0x22   :  { %132 = vmatpush.msra.mxu2 %v101_v36 }
  0x24   :  { %133 = vmatpush.msra.mxu2 %v100_v37 }
  0x26   :  { %134 = vmatpush.msra.mxu2 %v99_v38 }
  0x82   :  { %v54_v33 = vpop.f32.mrf.mxu0 }
  0x83   :  { %v55_v34 = vadd.f32 %v146_v32, %v54_v33 }
  0x85   :  { %v57_v35 = vmax.f32 %v55_v34, 0.0 }
  0x87   :  { %94 = vmatmul.f32.vlgmr.msra.gmra.mxu1 %v57_v35 }
 0x104   :  { %v95_v40 = vpop.f32.mrf.mxu1 }
 0x105   :  { %v96_v41 = vadd.f32 %v147_v39, %v95_v40 }
 0x107   :  { %v98_v42 = vmax.f32 %v96_v41, 0.0 }
 0x109   :  { %135 = vmatmul.f32.vlgmr.msra.gmra.mxu2 %v98_v42 }
 0x18c   :  { %v136_v44 = vpop.f32.mrf.mxu2 }
 0x18d   :  { %v137_v45 = vadd.f32 %v148_v43, %v136_v44 }
 0x18f   :  { %149 = vtanh.f32 %v137_v45 }
 0x195   :  { %v150_v46 = vpop.eup %149 }
 0x196   :  { %140 = vst [vmem:[%s315_s7] sm:$0xff] %v150_v46 }

</bundles_post_ra>
